<compile_context>
chip_gen: v7x
topology: tpu7x:2x2x1
jax: 0.10.0
libtpu: 0.0.40
codegen_flags: <defaults>
</compile_context>

<pallas_src>
import jax
import jax.numpy as jnp
from jax.experimental import pallas as pl
from jax.experimental.pallas import tpu as pltpu


def _dvqvae_loss_kernel(xt_ref, xre_ref, z_ref, zq_ref, out_ref):
    # Per grid step:
    #   xt_ref/xre_ref : (TB, S, D)    z_ref/zq_ref : (TB, Sz, Dz)
    #   out_ref        : (1, 8, 128) f32 partial sums; row 0 = smoothL1(pos),
    #                    row 1 = smoothL1(vel), row 2 = ||Z - Zq||^2,
    #                    replicated across lanes so the store is a full tile.
    TB, S, _ = xt_ref.shape

    def huber(z):
        # branch-free smooth-L1 (beta = 1): 0.5*z^2 if |z|<1 else |z|-0.5
        az = jnp.abs(z)
        c = jnp.minimum(az, 1.0)
        return c * (az - 0.5 * c)

    def row_body(b, carry):
        s_pos, s_vel = carry
        db = xt_ref[b].astype(jnp.float32) - xre_ref[b].astype(jnp.float32)  # (S, D)
        s_pos = s_pos + jnp.sum(huber(db))

        # velocity(X_T) - velocity(X_re) == velocity(db)  (velocity is linear):
        #   velocity(db)[s] = db[s+1] - db[s] for s < S-1;  velocity(db)[S-1] = db[S-1].
        if S == 1:
            s_vel = s_vel + jnp.sum(huber(db))
        elif S % 8 == 0:
            # One XLU sublane rotate; the single wrapped row contributes
            # huber(db[0] - db[S-1]) whichever rotation convention the op
            # uses (huber is even) -> subtract it, add the true last-row term.
            rolled = pltpu.roll(db, shift=S - 1, axis=0)
            s_vel = s_vel + (jnp.sum(huber(rolled - db))
                             - jnp.sum(huber(db[0:1, :] - db[S - 1:S, :]))
                             + jnp.sum(huber(db[S - 1:S, :])))
        else:
            # Unaligned S: conservative slice-based path (retiled copy, exact).
            s_vel = s_vel + (jnp.sum(huber(db[1:, :] - db[:-1, :]))
                             + jnp.sum(huber(db[S - 1:S, :])))
        return s_pos, s_vel

    s_pos, s_vel = jax.lax.fori_loop(
        0, TB, row_body, (jnp.float32(0.0), jnp.float32(0.0)),
        unroll=bool(TB <= 8))

    dz = z_ref[...].astype(jnp.float32) - zq_ref[...].astype(jnp.float32)
    s_z = jnp.sum(dz * dz)

    # Full lane-dense (8, 128) tile -> single unmasked vector store.
    row = jax.lax.broadcasted_iota(jnp.int32, (1, 8, 128), 1)
    out_ref[...] = jnp.where(
        row == 0, s_pos,
        jnp.where(row == 1, s_vel,
                  jnp.where(row == 2, s_z, 0.0)))


def _vmem_capacity_bytes():
    try:
        return int(pltpu.get_tpu_info().vmem_capacity_bytes)
    except Exception:
        return 64 * 1024 * 1024   # conservative fallback: v7x per-TensorCore VMEM


def _pick_batch_tile(B, row_in_bytes, row_tmp_bytes, fixed_tmp_bytes, vmem_budget):
    # (a) ~2 MiB of HBM traffic per grid step (DMA-efficiency knee),
    # (b) double-buffered inputs + temporaries fit the VMEM budget,
    # (c) keep >= ~8 grid steps when B allows it (pipeline depth / megacore),
    # (d) TB divides B exactly -> no padding copy of the inputs.
    target_step_bytes = 2 * 1024 * 1024
    tb_bytes = max(1, target_step_bytes // row_in_bytes)
    avail = max(row_in_bytes, vmem_budget - fixed_tmp_bytes - 2 * 1024 * 1024)
    tb_vmem = max(1, avail // (2 * row_in_bytes + row_tmp_bytes))
    tb_steps = B if B < 8 else max(1, B // 8)
    tb = int(max(1, min(tb_bytes, tb_vmem, tb_steps, B)))
    while B % tb:
        tb -= 1
    return tb


def dvqvae_loss(X_T, X_re, Z_T_l, Z_quantized, I_T, T, P_Y_given_X_re=None,
                lambda1=1.0, lambda2=0.5, lambda3=1.0, R=12):
    # P_Y_given_X_re and lambda3 are accepted for signature parity with the
    # PyTorch module; neither is used by its forward pass (matches PyTorch).
    B, S, D = X_T.shape
    Bz, Sz, Dz = Z_T_l.shape
    assert Bz == B

    x_item = X_T.dtype.itemsize
    z_item = Z_T_l.dtype.itemsize

    # Generation-aware scoped-VMEM budget.
    vmem_cap = _vmem_capacity_bytes()
    if vmem_cap >= 96 * 1024 * 1024:
        vmem_budget = 80 * 1024 * 1024        # v5e / v6e: 128 MiB physical VMEM
    else:
        vmem_budget = 44 * 1024 * 1024        # v7x: 64 MiB per TensorCore

    # Per-batch-row HBM bytes, per-row f32 temporaries (the in-kernel row loop
    # bounds them to a single row), and Z-block temporaries that scale with TB.
    row_in_bytes = 2 * S * D * x_item + 2 * Sz * Dz * z_item
    fixed_tmp_bytes = 8 * S * D * 4
    row_tmp_bytes = 4 * Sz * Dz * 4
    TB = _pick_batch_tile(B, row_in_bytes, row_tmp_bytes, fixed_tmp_bytes, vmem_budget)
    G = B // TB

    step_bytes = (2 * TB * row_in_bytes + TB * row_tmp_bytes
                  + fixed_tmp_bytes + 2 * 8 * 128 * 4)
    vmem_limit = int(min(vmem_budget, max(32 * 1024 * 1024, 2 * step_bytes)))

    n_x = B * S * D
    n_z = B * Sz * Dz
    cost = pl.CostEstimate(
        flops=int(20 * n_x + 3 * n_z),
        transcendentals=0,
        bytes_accessed=int(2 * n_x * x_item + 2 * n_z * z_item + G * 8 * 128 * 4),
    )

    parts = pl.pallas_call(
        _dvqvae_loss_kernel,
        out_shape=jax.ShapeDtypeStruct((G, 8, 128), jnp.float32),
        grid=(G,),
        in_specs=[
            pl.BlockSpec((TB, S, D), lambda b: (b, 0, 0)),
            pl.BlockSpec((TB, S, D), lambda b: (b, 0, 0)),
            pl.BlockSpec((TB, Sz, Dz), lambda b: (b, 0, 0)),
            pl.BlockSpec((TB, Sz, Dz), lambda b: (b, 0, 0)),
        ],
        out_specs=pl.BlockSpec((1, 8, 128), lambda b: (b, 0, 0)),
        compiler_params=pltpu.CompilerParams(
            dimension_semantics=("parallel",),   # disjoint output blocks ->
            vmem_limit_bytes=vmem_limit),        # batch splits over v7x's 2 TCs
        cost_estimate=cost,
    )(X_T, X_re, Z_T_l, Z_quantized)

    # Tiny epilogue (runs fused under jit): per-step partial sums are in
    # rows 0..2, lane 0 (replicated across lanes); f32 partials + one
    # cross-step sum keep the accumulation well conditioned.
    sums = jnp.sum(parts[:, :3, 0], axis=0)      # [s_pos, s_vel, s_z]

    n_x_f = float(n_x)                           # velocity tensor has same size
    n_z_f = float(n_z)
    L_X_re = sums[0] / n_x_f
    L_vel = sums[1] / n_x_f
    L_re = L_X_re + L_vel
    msz = sums[2] / n_z_f                        # .detach() has no fwd effect
    L_embed = msz
    L_commit = lambda1 * msz
    L_vq = L_re + L_embed + L_commit
    s_it = jnp.sum(I_T.astype(jnp.float32))      # B*Sz elems: stays in the wrapper
    L_budget = jnp.maximum(s_it - T / R, 0.0)    # clamp(sum(I_T) - T/R, min=0)
    L_total = L_vq + lambda2 * L_budget
    return L_total


if __name__ == "__main__":
    key = jax.random.PRNGKey(0)
    kx, kr, kz, kq, ki = jax.random.split(key, 5)

    B, S, D = 16, 16, 128    # pose sequence: (batch, time, joints*coords)
    Sz, Dz = 8, 128          # downsampled latent sequence

    X_T = jax.random.normal(kx, (B, S, D), dtype=jnp.float32)
    X_re = X_T + 0.1 * jax.random.normal(kr, (B, S, D), dtype=jnp.float32)
    Z_T_l = jax.random.normal(kz, (B, Sz, Dz), dtype=jnp.float32)
    Z_quantized = Z_T_l + 0.05 * jax.random.normal(kq, (B, Sz, Dz), dtype=jnp.float32)
    I_T = (jax.random.uniform(ki, (B, Sz)) > 0.5).astype(jnp.float32)
    T = float(S)
    P_Y_given_X_re = jnp.zeros((B, Sz, 16), dtype=jnp.float32)  # unused in forward

    loss_fn = jax.jit(dvqvae_loss)
    loss = loss_fn(X_T, X_re, Z_T_l, Z_quantized, I_T, T, P_Y_given_X_re)
    jax.block_until_ready(loss)

    # Pure-JAX reference (same math as the PyTorch module's forward).
    def ref_loss():
        def sl1(a, b):
            z = a - b
            az = jnp.abs(z)
            return jnp.mean(jnp.where(az < 1.0, 0.5 * z * z, az - 0.5))

        def vel(x):
            v = x[:, 1:, :] - x[:, :-1, :]
            return jnp.concatenate([v, x[:, -1:, :]], axis=1)

        L_X_re = sl1(X_T, X_re)
        L_re = L_X_re + sl1(vel(X_T), vel(X_re))
        L_embed = jnp.mean((Z_T_l - Z_quantized) ** 2)
        L_commit = 1.0 * jnp.mean((Z_T_l - Z_quantized) ** 2)
        L_vq = L_re + L_embed + L_commit
        L_budget = jnp.maximum(jnp.sum(I_T) - T / 12, 0.0)
        return L_vq + 0.5 * L_budget

    ref = ref_loss()
    assert jnp.allclose(loss, ref, rtol=1e-5, atol=1e-5), (loss, ref)
    print("KERNEL_OK")
</pallas_src>

<mosaic_0001>
module attributes {stable_mosaic.version = 11 : i64} {
  func.func @_dvqvae_loss_kernel(%arg0: i32, %arg1: memref<2x16x128xf32, #tpu.memory_space<vmem>>, %arg2: memref<2x16x128xf32, #tpu.memory_space<vmem>>, %arg3: memref<2x8x128xf32, #tpu.memory_space<vmem>>, %arg4: memref<2x8x128xf32, #tpu.memory_space<vmem>>, %arg5: memref<1x8x128xf32, #tpu.memory_space<vmem>>) attributes {dimension_semantics = [#tpu.dimension_semantics<parallel>], iteration_bounds = array<i64: 8>, scalar_prefetch = 0 : i64, scratch_operands = 0 : i64, tpu.core_type = #tpu.core_type<tc>, window_params = [{transform_indices = @transform_0, window_bounds = array<i64: 2, 16, 128>}, {transform_indices = @transform_1, window_bounds = array<i64: 2, 16, 128>}, {transform_indices = @transform_2, window_bounds = array<i64: 2, 8, 128>}, {transform_indices = @transform_3, window_bounds = array<i64: 2, 8, 128>}, {transform_indices = @transform_4, window_bounds = array<i64: 1, 8, 128>}]} {
    %cst = arith.constant 0.000000e+00 : f32
    %cst_0 = arith.constant 0.000000e+00 : f32
    %c0_i32 = arith.constant 0 : i32
    %0 = arith.index_cast %c0_i32 : i32 to index
    %c0 = arith.constant 0 : index
    %c0_1 = arith.constant 0 : index
    %1 = vector.load %arg1[%0, %c0, %c0_1] : memref<2x16x128xf32, #tpu.memory_space<vmem>>, vector<1x16x128xf32>
    %2 = vector.shape_cast %1 : vector<1x16x128xf32> to vector<16x128xf32>
    %3 = arith.index_cast %c0_i32 : i32 to index
    %c0_2 = arith.constant 0 : index
    %c0_3 = arith.constant 0 : index
    %4 = vector.load %arg2[%3, %c0_2, %c0_3] : memref<2x16x128xf32, #tpu.memory_space<vmem>>, vector<1x16x128xf32>
    %5 = vector.shape_cast %4 : vector<1x16x128xf32> to vector<16x128xf32>
    %6 = arith.subf %2, %5 : vector<16x128xf32>
    %7 = math.absf %6 : vector<16x128xf32>
    %cst_4 = arith.constant 1.000000e+00 : f32
    %8 = vector.broadcast %cst_4 : f32 to vector<16x128xf32>
    %9 = arith.minimumf %7, %8 : vector<16x128xf32>
    %cst_5 = arith.constant 5.000000e-01 : f32
    %10 = vector.broadcast %cst_5 : f32 to vector<16x128xf32>
    %11 = arith.mulf %10, %9 : vector<16x128xf32>
    %12 = arith.subf %7, %11 : vector<16x128xf32>
    %13 = arith.mulf %9, %12 : vector<16x128xf32>
    %14 = vector.shape_cast %13 : vector<16x128xf32> to vector<1x16x128xf32>
    %cst_6 = arith.constant dense<0.000000e+00> : vector<1xf32>
    %15 = vector.multi_reduction <add>, %14, %cst_6 [1, 2] : vector<1x16x128xf32> to vector<1xf32>
    %16 = vector.shape_cast %15 : vector<1xf32> to vector<1x1x1xf32>
    %17 = vector.extract %16[0, 0, 0] : f32 from vector<1x1x1xf32>
    %18 = arith.addf %cst, %17 : f32
    %c15_i32 = arith.constant 15 : i32
    %19 = tpu.dynamic_rotate %6 by %c15_i32 dim 0 : vector<16x128xf32>, i32 -> vector<16x128xf32>
    %20 = arith.subf %19, %6 : vector<16x128xf32>
    %21 = math.absf %20 : vector<16x128xf32>
    %cst_7 = arith.constant 1.000000e+00 : f32
    %22 = vector.broadcast %cst_7 : f32 to vector<16x128xf32>
    %23 = arith.minimumf %21, %22 : vector<16x128xf32>
    %cst_8 = arith.constant 5.000000e-01 : f32
    %24 = vector.broadcast %cst_8 : f32 to vector<16x128xf32>
    %25 = arith.mulf %24, %23 : vector<16x128xf32>
    %26 = arith.subf %21, %25 : vector<16x128xf32>
    %27 = arith.mulf %23, %26 : vector<16x128xf32>
    %28 = vector.shape_cast %27 : vector<16x128xf32> to vector<1x16x128xf32>
    %cst_9 = arith.constant dense<0.000000e+00> : vector<1xf32>
    %29 = vector.multi_reduction <add>, %28, %cst_9 [1, 2] : vector<1x16x128xf32> to vector<1xf32>
    %30 = vector.shape_cast %29 : vector<1xf32> to vector<1x1x1xf32>
    %31 = vector.extract %30[0, 0, 0] : f32 from vector<1x1x1xf32>
    %32 = vector.extract_strided_slice %6 {offsets = [0, 0], sizes = [1, 128], strides = [1, 1]} : vector<16x128xf32> to vector<1x128xf32>
    %33 = vector.extract_strided_slice %6 {offsets = [15, 0], sizes = [1, 128], strides = [1, 1]} : vector<16x128xf32> to vector<1x128xf32>
    %34 = arith.subf %32, %33 : vector<1x128xf32>
    %35 = math.absf %34 : vector<1x128xf32>
    %cst_10 = arith.constant 1.000000e+00 : f32
    %36 = vector.broadcast %cst_10 : f32 to vector<1x128xf32>
    %37 = arith.minimumf %35, %36 : vector<1x128xf32>
    %cst_11 = arith.constant 5.000000e-01 : f32
    %38 = vector.broadcast %cst_11 : f32 to vector<1x128xf32>
    %39 = arith.mulf %38, %37 : vector<1x128xf32>
    %40 = arith.subf %35, %39 : vector<1x128xf32>
    %41 = arith.mulf %37, %40 : vector<1x128xf32>
    %42 = vector.shape_cast %41 : vector<1x128xf32> to vector<1x1x128xf32>
    %cst_12 = arith.constant dense<0.000000e+00> : vector<1xf32>
    %43 = vector.multi_reduction <add>, %42, %cst_12 [1, 2] : vector<1x1x128xf32> to vector<1xf32>
    %44 = vector.shape_cast %43 : vector<1xf32> to vector<1x1x1xf32>
    %45 = vector.extract %44[0, 0, 0] : f32 from vector<1x1x1xf32>
    %46 = arith.subf %31, %45 : f32
    %47 = vector.extract_strided_slice %6 {offsets = [15, 0], sizes = [1, 128], strides = [1, 1]} : vector<16x128xf32> to vector<1x128xf32>
    %48 = math.absf %47 : vector<1x128xf32>
    %cst_13 = arith.constant 1.000000e+00 : f32
    %49 = vector.broadcast %cst_13 : f32 to vector<1x128xf32>
    %50 = arith.minimumf %48, %49 : vector<1x128xf32>
    %cst_14 = arith.constant 5.000000e-01 : f32
    %51 = vector.broadcast %cst_14 : f32 to vector<1x128xf32>
    %52 = arith.mulf %51, %50 : vector<1x128xf32>
    %53 = arith.subf %48, %52 : vector<1x128xf32>
    %54 = arith.mulf %50, %53 : vector<1x128xf32>
    %55 = vector.shape_cast %54 : vector<1x128xf32> to vector<1x1x128xf32>
    %cst_15 = arith.constant dense<0.000000e+00> : vector<1xf32>
    %56 = vector.multi_reduction <add>, %55, %cst_15 [1, 2] : vector<1x1x128xf32> to vector<1xf32>
    %57 = vector.shape_cast %56 : vector<1xf32> to vector<1x1x1xf32>
    %58 = vector.extract %57[0, 0, 0] : f32 from vector<1x1x1xf32>
    %59 = arith.addf %46, %58 : f32
    %60 = arith.addf %cst_0, %59 : f32
    %c1_i32 = arith.constant 1 : i32
    %61 = arith.index_cast %c1_i32 : i32 to index
    %c0_16 = arith.constant 0 : index
    %c0_17 = arith.constant 0 : index
    %62 = vector.load %arg1[%61, %c0_16, %c0_17] : memref<2x16x128xf32, #tpu.memory_space<vmem>>, vector<1x16x128xf32>
    %63 = vector.shape_cast %62 : vector<1x16x128xf32> to vector<16x128xf32>
    %64 = arith.index_cast %c1_i32 : i32 to index
    %c0_18 = arith.constant 0 : index
    %c0_19 = arith.constant 0 : index
    %65 = vector.load %arg2[%64, %c0_18, %c0_19] : memref<2x16x128xf32, #tpu.memory_space<vmem>>, vector<1x16x128xf32>
    %66 = vector.shape_cast %65 : vector<1x16x128xf32> to vector<16x128xf32>
    %67 = arith.subf %63, %66 : vector<16x128xf32>
    %68 = math.absf %67 : vector<16x128xf32>
    %cst_20 = arith.constant 1.000000e+00 : f32
    %69 = vector.broadcast %cst_20 : f32 to vector<16x128xf32>
    %70 = arith.minimumf %68, %69 : vector<16x128xf32>
    %cst_21 = arith.constant 5.000000e-01 : f32
    %71 = vector.broadcast %cst_21 : f32 to vector<16x128xf32>
    %72 = arith.mulf %71, %70 : vector<16x128xf32>
    %73 = arith.subf %68, %72 : vector<16x128xf32>
    %74 = arith.mulf %70, %73 : vector<16x128xf32>
    %75 = vector.shape_cast %74 : vector<16x128xf32> to vector<1x16x128xf32>
    %cst_22 = arith.constant dense<0.000000e+00> : vector<1xf32>
    %76 = vector.multi_reduction <add>, %75, %cst_22 [1, 2] : vector<1x16x128xf32> to vector<1xf32>
    %77 = vector.shape_cast %76 : vector<1xf32> to vector<1x1x1xf32>
    %78 = vector.extract %77[0, 0, 0] : f32 from vector<1x1x1xf32>
    %79 = arith.addf %18, %78 : f32
    %c15_i32_23 = arith.constant 15 : i32
    %80 = tpu.dynamic_rotate %67 by %c15_i32_23 dim 0 : vector<16x128xf32>, i32 -> vector<16x128xf32>
    %81 = arith.subf %80, %67 : vector<16x128xf32>
    %82 = math.absf %81 : vector<16x128xf32>
    %cst_24 = arith.constant 1.000000e+00 : f32
    %83 = vector.broadcast %cst_24 : f32 to vector<16x128xf32>
    %84 = arith.minimumf %82, %83 : vector<16x128xf32>
    %cst_25 = arith.constant 5.000000e-01 : f32
    %85 = vector.broadcast %cst_25 : f32 to vector<16x128xf32>
    %86 = arith.mulf %85, %84 : vector<16x128xf32>
    %87 = arith.subf %82, %86 : vector<16x128xf32>
    %88 = arith.mulf %84, %87 : vector<16x128xf32>
    %89 = vector.shape_cast %88 : vector<16x128xf32> to vector<1x16x128xf32>
    %cst_26 = arith.constant dense<0.000000e+00> : vector<1xf32>
    %90 = vector.multi_reduction <add>, %89, %cst_26 [1, 2] : vector<1x16x128xf32> to vector<1xf32>
    %91 = vector.shape_cast %90 : vector<1xf32> to vector<1x1x1xf32>
    %92 = vector.extract %91[0, 0, 0] : f32 from vector<1x1x1xf32>
    %93 = vector.extract_strided_slice %67 {offsets = [0, 0], sizes = [1, 128], strides = [1, 1]} : vector<16x128xf32> to vector<1x128xf32>
    %94 = vector.extract_strided_slice %67 {offsets = [15, 0], sizes = [1, 128], strides = [1, 1]} : vector<16x128xf32> to vector<1x128xf32>
    %95 = arith.subf %93, %94 : vector<1x128xf32>
    %96 = math.absf %95 : vector<1x128xf32>
    %cst_27 = arith.constant 1.000000e+00 : f32
    %97 = vector.broadcast %cst_27 : f32 to vector<1x128xf32>
    %98 = arith.minimumf %96, %97 : vector<1x128xf32>
    %cst_28 = arith.constant 5.000000e-01 : f32
    %99 = vector.broadcast %cst_28 : f32 to vector<1x128xf32>
    %100 = arith.mulf %99, %98 : vector<1x128xf32>
    %101 = arith.subf %96, %100 : vector<1x128xf32>
    %102 = arith.mulf %98, %101 : vector<1x128xf32>
    %103 = vector.shape_cast %102 : vector<1x128xf32> to vector<1x1x128xf32>
    %cst_29 = arith.constant dense<0.000000e+00> : vector<1xf32>
    %104 = vector.multi_reduction <add>, %103, %cst_29 [1, 2] : vector<1x1x128xf32> to vector<1xf32>
    %105 = vector.shape_cast %104 : vector<1xf32> to vector<1x1x1xf32>
    %106 = vector.extract %105[0, 0, 0] : f32 from vector<1x1x1xf32>
    %107 = arith.subf %92, %106 : f32
    %108 = vector.extract_strided_slice %67 {offsets = [15, 0], sizes = [1, 128], strides = [1, 1]} : vector<16x128xf32> to vector<1x128xf32>
    %109 = math.absf %108 : vector<1x128xf32>
    %cst_30 = arith.constant 1.000000e+00 : f32
    %110 = vector.broadcast %cst_30 : f32 to vector<1x128xf32>
    %111 = arith.minimumf %109, %110 : vector<1x128xf32>
    %cst_31 = arith.constant 5.000000e-01 : f32
    %112 = vector.broadcast %cst_31 : f32 to vector<1x128xf32>
    %113 = arith.mulf %112, %111 : vector<1x128xf32>
    %114 = arith.subf %109, %113 : vector<1x128xf32>
    %115 = arith.mulf %111, %114 : vector<1x128xf32>
    %116 = vector.shape_cast %115 : vector<1x128xf32> to vector<1x1x128xf32>
    %cst_32 = arith.constant dense<0.000000e+00> : vector<1xf32>
    %117 = vector.multi_reduction <add>, %116, %cst_32 [1, 2] : vector<1x1x128xf32> to vector<1xf32>
    %118 = vector.shape_cast %117 : vector<1xf32> to vector<1x1x1xf32>
    %119 = vector.extract %118[0, 0, 0] : f32 from vector<1x1x1xf32>
    %120 = arith.addf %107, %119 : f32
    %121 = arith.addf %60, %120 : f32
    %c2_i32 = arith.constant 2 : i32
    %c0_33 = arith.constant 0 : index
    %c0_34 = arith.constant 0 : index
    %c0_35 = arith.constant 0 : index
    %122 = vector.load %arg3[%c0_33, %c0_34, %c0_35] : memref<2x8x128xf32, #tpu.memory_space<vmem>>, vector<2x8x128xf32>
    %c0_36 = arith.constant 0 : index
    %c0_37 = arith.constant 0 : index
    %c0_38 = arith.constant 0 : index
    %123 = vector.load %arg4[%c0_36, %c0_37, %c0_38] : memref<2x8x128xf32, #tpu.memory_space<vmem>>, vector<2x8x128xf32>
    %124 = arith.subf %122, %123 : vector<2x8x128xf32>
    %125 = arith.mulf %124, %124 : vector<2x8x128xf32>
    %126 = vector.shape_cast %125 : vector<2x8x128xf32> to vector<1x2x8x128xf32>
    %cst_39 = arith.constant dense<0.000000e+00> : vector<1xf32>
    %127 = vector.multi_reduction <add>, %126, %cst_39 [1, 2, 3] : vector<1x2x8x128xf32> to vector<1xf32>
    %128 = vector.shape_cast %127 : vector<1xf32> to vector<1x1x1x1xf32>
    %129 = vector.extract %128[0, 0, 0, 0] : f32 from vector<1x1x1x1xf32>
    %130 = tpu.iota {dimensions = array<i32: 1>} : vector<1x8x128xi32>
    %c0_i32_40 = arith.constant 0 : i32
    %131 = vector.broadcast %c0_i32_40 : i32 to vector<1x8x128xi32>
    %132 = arith.cmpi eq, %130, %131 : vector<1x8x128xi32>
    %c1_i32_41 = arith.constant 1 : i32
    %133 = vector.broadcast %c1_i32_41 : i32 to vector<1x8x128xi32>
    %134 = arith.cmpi eq, %130, %133 : vector<1x8x128xi32>
    %c2_i32_42 = arith.constant 2 : i32
    %135 = vector.broadcast %c2_i32_42 : i32 to vector<1x8x128xi32>
    %136 = arith.cmpi eq, %130, %135 : vector<1x8x128xi32>
    %cst_43 = arith.constant 0.000000e+00 : f32
    %137 = vector.broadcast %129 : f32 to vector<1x8x128xf32>
    %138 = vector.broadcast %cst_43 : f32 to vector<1x8x128xf32>
    %139 = arith.select %136, %137, %138 : vector<1x8x128xi1>, vector<1x8x128xf32>
    %140 = vector.broadcast %121 : f32 to vector<1x8x128xf32>
    %141 = arith.select %134, %140, %139 : vector<1x8x128xi1>, vector<1x8x128xf32>
    %142 = vector.broadcast %79 : f32 to vector<1x8x128xf32>
    %143 = arith.select %132, %142, %141 : vector<1x8x128xi1>, vector<1x8x128xf32>
    %c0_44 = arith.constant 0 : index
    %c0_45 = arith.constant 0 : index
    %c0_46 = arith.constant 0 : index
    %144 = vector.load %arg5[%c0_44, %c0_45, %c0_46] : memref<1x8x128xf32, #tpu.memory_space<vmem>>, vector<1x8x128xf32>
    tpu.vector_store %arg5[%c0_44, %c0_45, %c0_46], %143 {strides = array<i32>} : memref<1x8x128xf32, #tpu.memory_space<vmem>>, vector<1x8x128xf32>,
    return
  }
  func.func @transform_0(%arg0: i32) -> (i32, i32, i32) {
    %c0_i32 = arith.constant 0 : i32
    %c0_i32_0 = arith.constant 0 : i32
    %c0_i32_1 = arith.constant 0 : i32
    return %arg0, %c0_i32, %c0_i32_0 : i32, i32, i32
  }
  func.func @transform_1(%arg0: i32) -> (i32, i32, i32) {
    %c0_i32 = arith.constant 0 : i32
    %c0_i32_0 = arith.constant 0 : i32
    %c0_i32_1 = arith.constant 0 : i32
    return %arg0, %c0_i32, %c0_i32_0 : i32, i32, i32
  }
  func.func @transform_2(%arg0: i32) -> (i32, i32, i32) {
    %c0_i32 = arith.constant 0 : i32
    %c0_i32_0 = arith.constant 0 : i32
    %c0_i32_1 = arith.constant 0 : i32
    return %arg0, %c0_i32, %c0_i32_0 : i32, i32, i32
  }
  func.func @transform_3(%arg0: i32) -> (i32, i32, i32) {
    %c0_i32 = arith.constant 0 : i32
    %c0_i32_0 = arith.constant 0 : i32
    %c0_i32_1 = arith.constant 0 : i32
    return %arg0, %c0_i32, %c0_i32_0 : i32, i32, i32
  }
  func.func @transform_4(%arg0: i32) -> (i32, i32, i32) {
    %c0_i32 = arith.constant 0 : i32
    %c0_i32_0 = arith.constant 0 : i32
    %c0_i32_1 = arith.constant 0 : i32
    return %arg0, %c0_i32, %c0_i32_0 : i32, i32, i32
  }
}

</mosaic_0001>

<bundles_post_ra>
// kernel: dvqvae_loss.1
= control target key start
LH: loop header
LB: loop body
LE: loop exit
PB: predicated region body
PF: predicated region fallthrough
CT: control target
= control target key end

     0   :  { %9 = vsyncpa [#allocation3], 0  ;;  %s1262_s0 = inlined_call_operand.hbm [shape: f32[16,16,128], index: 0, kind: input, shape index: {}]   ;;  %s1263_s1 = inlined_call_operand.hbm [shape: f32[16,16,128], index: 1, kind: input, shape index: {}]   ;;  %s1264_s2 = inlined_call_operand.hbm [shape: f32[16,8,128], index: 2, kind: input, shape index: {}]   ;;  %s1265_s3 = inlined_call_operand.hbm [shape: f32[16,8,128], index: 3, kind: input, shape index: {}]   ;;  %s1266_s4 = inlined_call_operand.vmem [shape: f32[8,8,128], index: 4, kind: output, shape index: {}]  }
   0x1   :  { %11 = vsyncpa [#allocation3 + $0x1], 0 }
   0x2   :  { %12 = vsyncpa [#allocation5], 0 }
   0x3   :  { %14 = vsyncpa [#allocation5 + $0x1], 0 }
   0x4   :  { %15 = vsyncpa [#allocation8], 0 }
   0x5   :  { %17 = vsyncpa [#allocation8 + $0x1], 0  ;;  %s984_s15 = smov 0   ;;  %s986_s16 = smov 0  }
   0x6   :  { %s988_s17 = smov 0   ;;  %s990_s18 = smov 0  }
   0x7 LB: > { %s1003_s19 = sadd.s32 4294967295, %s951_s18   ;;  %s1006_s20 = sadd.s32 1, %s951_s18   ;;  %s951_s18 = sphi %s990_s18, %s1279_s18   ;;  %s947_s17 = sphi %s988_s17, %s1278_s17   ;;  %s943_s16 = sphi %s986_s16, %s1277_s16   ;;  %s939_s15 = sphi %s984_s15, %s1276_s15  }
   0x8   : > { %s27_s21 = ssub.s32 %s951_s18, %s1006_s20  ;;  %s30_s22 = sadd.s32 1, %s947_s17 }
   0x9   : > { %p28_p0 = scmp.eq.s32.totalorder %s27_s21, 0  ;;  %p37_p1 = scmp.ne.s32.totalorder %s947_s17, %s943_s16 }
   0xa   : > { %p38_p2 = scmp.eq.s32.totalorder %s951_s18, 0  ;;  %p43_p3 = scmp.ne.s32.totalorder %s943_s16, %s939_s15 }
   0xb   : > { %s1016_s23 = scalar_select %p28_p0, %s947_s17, %s30_s22  }
   0xc   : > { %p39_p4 = por %p38_p2, %p37_p1  ;;  %p44_p5 = scmp.eq.s32.totalorder %s1003_s19, 0 }
   0xd   : > { %p754_p6 = scmp.lt.s32.totalorder %s951_s18, 8  ;;  %s1025_s25 = sand.u32 1, %s947_s17  }
   0xe   : > { %p1020_p7 = por %p44_p5, %p43_p3  ;;  %s683_s26 = sshll.u32 %s1025_s25, 5 }
   0xf   : > { %s710_s27 = sshll.u32 %s951_s18, 9  ;;  %p1029_p8 = pnand %p754_p6, %p39_p4 }
  0x10   : > { %s1268_s24 = scalar_select %p1020_p7, 1, 0 }
  0x11   : > { %s193_s29 = sand.u32 1, %s951_s18   ;;  %s1039_s6 = scalar_lea.hbm %s1263_s1, %s710_s27 }
  0x12   : > { %s197_s7 = scalar_lea.vmem [#allocation4], %s683_s26  ;;  %s1047_s9 = scalar_lea.sflag [#allocation5], %s193_s29 }
  0x13   : > { %s205_s8 = sshll.u32 %s197_s7, 4  ;;  %s789_s10 = scalar_lea.hbm %s1039_s6, 512  ;;  %s1044_s8 = int_to_ptr.vmem [resolvable:$true] %s205_s8 }
  0x14   : > { %p790_p11 = scmp.ne.s32.totalorder %s1039_s6, %s789_s10  ;;  %p1053_p12 = pneg %p1029_p8 }
  0x15   : > { %s794_s14 = scalar_lea.hbm %s1263_s1, 4096  ;;  %p795_p1 = scmp.lt.u32.totalorder %s1039_s6, %s1263_s1 }
  0x16   : > { %p792_p13 = pnand %p1053_p12, %p790_p11  ;;  %p796_p2 = scmp.lt.u32.totalorder %s794_s14, %s789_s10 }
  0x17   : > { %p798_p4 = scmp.lt.u32.totalorder %s789_s10, %s1039_s6 }
  0x18   : > { %p793_p0 = pneg %p792_p13  ;;  %p797_p3 = por %p796_p2, %p795_p1 }
  0x1a   : > { %p799_p5 = por %p798_p4, %p797_p3 }
  0x1c   : > { %p800_p6 = pnand %p799_p5, %p793_p0 }
  0x1e   : > { %803 = shalt.err (!%p800_p6)
}
  0x1f   : > { %s804_s22 = scalar_lea.vmem %s1044_s8, 512  ;;  %s953_s29 = smov [#allocation4]  }
  0x20   : > { %p805_p11 = scmp.ne.s32.totalorder %s1044_s8, %s804_s22  ;;  %s809_s30 = sshll.u32 %s953_s29, 4  ;;  %s810_s30 = int_to_ptr.vmem [resolvable:$false] %s809_s30 }
  0x21   : > { %s811_s5 = scalar_lea.vmem %s810_s30, 1024  ;;  %p812_p10 = scmp.lt.s32.totalorder %s1044_s8, %s810_s30 }
  0x22   : > { %p807_p13 = pnand %p805_p11, %p1053_p12  ;;  %p813_p7 = scmp.lt.s32.totalorder %s811_s5, %s804_s22 }
  0x24   : > { %p808_p9 = pneg %p807_p13  ;;  %p814_p1 = por %p813_p7, %p812_p10 }
  0x26   : > { %p815_p2 = pnand %p814_p1, %p808_p9 }
  0x28   : > { %818 = shalt.err (!%p815_p2)
}
  0x29   : > { %s954_s7 = smov 128   ;;  %s955_s10 = smov 8  }
  0x2a   : > { %747 = dma.hbm_to_vmem [thread:$0]  (!%p1029_p8), %s1039_s6, 512, %s1044_s8, %s1047_s9, %s954_s7, %s954_s7, %s955_s10  }
  0x2b   : > { %p1271_p7 = scmp.lt.s32.totalorder %s951_s18, 9  ;;  %p1272_p9 = scmp.ge.s32.totalorder %s951_s18, 1 }
  0x2c   : > { %s1093_s15 = scalar_lea.hbm %s1262_s0, %s710_s27  ;;  %s175_s21 = scalar_lea.vmem [#allocation2], %s683_s26 }
  0x2d   : > { %p1084_p10 = pnand %p1272_p9, %p1271_p7  ;;  %s183_s22 = sshll.u32 %s175_s21, 4  ;;  %s1098_s22 = int_to_ptr.vmem [resolvable:$true] %s183_s22 }
  0x2e   : > { %s691_s6 = sshll.u32 %s1025_s25, 4  ;;  %s172_s8 = scalar_lea.sflag [#allocation3], %s1025_s25 }
  0x2f   : > { %s1273_s12 = scalar_select %p1084_p10, 1, 0 }
  0x30   : > { %s819_s29 = scalar_lea.hbm %s1093_s15, 512  ;;  %s824_s27 = scalar_lea.hbm %s1262_s0, 4096 }
  0x31   : > { %p820_p0 = scmp.ne.s32.totalorder %s1093_s15, %s819_s29  ;;  %p825_p5 = scmp.lt.u32.totalorder %s1093_s15, %s1262_s0 }
  0x32   : > { %p826_p6 = scmp.lt.u32.totalorder %s824_s27, %s819_s29  ;;  %p828_p13 = scmp.lt.u32.totalorder %s819_s29, %s1093_s15 }
  0x33   : > { %p822_p3 = pnand %p820_p0, %p1053_p12 }
  0x34   : > { %p827_p11 = por %p826_p6, %p825_p5 }
  0x35   : > { %p823_p4 = pneg %p822_p3 }
  0x36   : > { %p829_p1 = por %p828_p13, %p827_p11 }
  0x38   : > { %p830_p2 = pnand %p829_p1, %p823_p4 }
  0x3a   : > { %833 = shalt.err (!%p830_p2)
}
  0x3b   : > { %s834_s26 = scalar_lea.vmem %s1098_s22, 512  ;;  %s956_s21 = smov [#allocation2]  }
  0x3c   : > { %p835_p7 = scmp.ne.s32.totalorder %s1098_s22, %s834_s26  ;;  %s839_s30 = sshll.u32 %s956_s21, 4  ;;  %s840_s30 = int_to_ptr.vmem [resolvable:$false] %s839_s30 }
  0x3d   : > { %s841_s5 = scalar_lea.vmem %s840_s30, 1024  ;;  %p842_p3 = scmp.lt.s32.totalorder %s1098_s22, %s840_s30 }
  0x3e   : > { %p837_p9 = pnand %p835_p7, %p1053_p12  ;;  %p843_p10 = scmp.lt.s32.totalorder %s841_s5, %s834_s26 }
  0x40   : > { %p838_p0 = pneg %p837_p9  ;;  %p844_p5 = por %p843_p10, %p842_p3 }
  0x42   : > { %p845_p6 = pnand %p844_p5, %p838_p0 }
  0x44   : > { %848 = shalt.err (!%p845_p6)
}
  0x45   : > { %744 = dma.hbm_to_vmem [thread:$0]  (!%p1029_p8), %s1093_s15, 512, %s1098_s22, %s172_s8, %s954_s7, %s954_s7, %s955_s10  }
  0x46   : > { %s713_s29 = sshll.u32 %s951_s18, 8  ;;  %s219_s27 = scalar_lea.vmem [#allocation6], %s691_s6 }
  0x47   : > { %s226_s13 = sshll.u32 %s219_s27, 4  ;;  %s1135_s21 = scalar_lea.hbm %s1264_s2, %s713_s29  ;;  %s1137_s13 = int_to_ptr.vmem [resolvable:$true] %s226_s13 }
  0x48   : > { %s849_s30 = scalar_lea.hbm %s1135_s21, 256  ;;  %s854_s8 = scalar_lea.hbm %s1264_s2, 2048 }
  0x49   : > { %p850_p10 = scmp.ne.s32.totalorder %s1135_s21, %s849_s30  ;;  %p855_p13 = scmp.lt.u32.totalorder %s1135_s21, %s1264_s2 }
  0x4a   : > { %p856_p1 = scmp.lt.u32.totalorder %s854_s8, %s849_s30  ;;  %p858_p7 = scmp.lt.u32.totalorder %s849_s30, %s1135_s21 }
  0x4b   : > { %p852_p4 = pnand %p850_p10, %p1053_p12 }
  0x4c   : > { %p857_p2 = por %p856_p1, %p855_p13 }
  0x4d   : > { %p853_p11 = pneg %p852_p4 }
  0x4e   : > { %p859_p9 = por %p858_p7, %p857_p2 }
  0x50   : > { %p860_p0 = pnand %p859_p9, %p853_p11 }
  0x52   : > { %863 = shalt.err (!%p860_p0)
}
  0x53   : > { %s864_s14 = scalar_lea.vmem %s1137_s13, 256  ;;  %s957_s26 = smov [#allocation6]  }
  0x54   : > { %p865_p3 = scmp.ne.s32.totalorder %s1137_s13, %s864_s14  ;;  %s869_s15 = sshll.u32 %s957_s26, 4  ;;  %s870_s15 = int_to_ptr.vmem [resolvable:$false] %s869_s15 }
  0x55   : > { %s871_s22 = scalar_lea.vmem %s870_s15, 512  ;;  %p872_p10 = scmp.lt.s32.totalorder %s1137_s13, %s870_s15 }
  0x56   : > { %p867_p5 = pnand %p865_p3, %p1053_p12  ;;  %p873_p4 = scmp.lt.s32.totalorder %s871_s22, %s864_s14 }
  0x58   : > { %p868_p6 = pneg %p867_p5  ;;  %p874_p13 = por %p873_p4, %p872_p10 }
  0x5a   : > { %p875_p1 = pnand %p874_p13, %p868_p6 }
  0x5c   : > { %878 = shalt.err (!%p875_p1)
}
  0x5d   : > { %750 = dma.hbm_to_vmem [thread:$0]  (!%p1029_p8), %s1135_s21, 256, %s1137_s13, %s1047_s9, %s954_s7, %s954_s7, %s955_s10  }
  0x5e   : > { %s1169_s5 = scalar_lea.hbm %s1265_s3, %s713_s29  ;;  %s240_s27 = scalar_lea.vmem [#allocation7], %s691_s6 }
  0x5f   : > { %s247_s14 = sshll.u32 %s240_s27, 4  ;;  %s237_s26 = scalar_lea.sflag [#allocation8], %s1025_s25  ;;  %s1173_s14 = int_to_ptr.vmem [resolvable:$true] %s247_s14 }
  0x60   : > { %s879_s15 = scalar_lea.hbm %s1169_s5, 256  ;;  %s884_s29 = scalar_lea.hbm %s1265_s3, 2048 }
  0x61   : > { %p880_p11 = scmp.ne.s32.totalorder %s1169_s5, %s879_s15  ;;  %p885_p9 = scmp.lt.u32.totalorder %s1169_s5, %s1265_s3 }
  0x62   : > { %p886_p0 = scmp.lt.u32.totalorder %s884_s29, %s879_s15  ;;  %p888_p5 = scmp.lt.u32.totalorder %s879_s15, %s1169_s5 }
  0x63   : > { %p882_p2 = pnand %p880_p11, %p1053_p12 }
  0x64   : > { %p887_p3 = por %p886_p0, %p885_p9 }
  0x65   : > { %p883_p7 = pneg %p882_p2 }
  0x66   : > { %p889_p6 = por %p888_p5, %p887_p3 }
  0x68   : > { %p890_p10 = pnand %p889_p6, %p883_p7 }
  0x6a   : > { %893 = shalt.err (!%p890_p10)
}
  0x6b   : > { %s894_s6 = scalar_lea.vmem %s1173_s14, 256  ;;  %s958_s22 = smov [#allocation7]  }
  0x6c   : > { %p895_p4 = scmp.ne.s32.totalorder %s1173_s14, %s894_s6  ;;  %s899_s30 = sshll.u32 %s958_s22, 4  ;;  %s900_s30 = int_to_ptr.vmem [resolvable:$false] %s899_s30 }
  0x6d   : > { %s901_s8 = scalar_lea.vmem %s900_s30, 512  ;;  %p902_p11 = scmp.lt.s32.totalorder %s1173_s14, %s900_s30 }
  0x6e   : > { %p897_p13 = pnand %p895_p4, %p1053_p12  ;;  %p903_p2 = scmp.lt.s32.totalorder %s901_s8, %s894_s6 }
  0x70   : > { %p898_p1 = pneg %p897_p13  ;;  %p904_p9 = por %p903_p2, %p902_p11 }
  0x72   : > { %p905_p0 = pnand %p904_p9, %p898_p1 }
  0x74   : > { %908 = shalt.err (!%p905_p0)
}
  0x75   : > { %753 = dma.hbm_to_vmem [thread:$0]  (!%p1029_p8), %s1169_s5, 256, %s1173_s14, %s237_s26, %s954_s7, %s954_s7, %s955_s10  }
  0x76   : > { %p1274_p12 = scmp.ne.s32.totalorder %s1273_s12, 0 }
  0x77   : > { %s261_s11 = sand.u32 (!%p1274_p12), 1, %s943_s16   ;;  %p1275_p7 = scmp.ne.s32.totalorder (!%p1274_p12), %s1268_s24, 0 }
  0x78   : > { %259 = sbr.rel (%p1274_p12) target bundleno = 379 (0x17b), region = 36  ;;  %s698_s27 = sshll.u32 (!%p1274_p12), %s261_s11, 5 }
  0x79   : > { %s262_s15 = scalar_lea.sflag (!%p1274_p12), [#allocation3], %s261_s11  ;;  %s265_s18 = scalar_lea.vmem (!%p1274_p12), [#allocation2], %s698_s27 }
  0x7f   : > { %926 = dma.done.wait (%p1275_p7), %s262_s15, 512  }
  0x80   : > { %928 = vsyncadd (%p1275_p7), %s262_s15, 4294966784  ;;  %s270_s25 = sand.u32 1, %s1003_s19   ;;  %s274_s9 = scalar_lea.vmem [#allocation4], %s698_s27 }
  0x81   : > { %s271_s28 = scalar_lea.sflag [#allocation5], %s270_s25 }
  0x82   : > { %930 = dma.done.wait (%p1275_p7), %s271_s28, 768  }
  0x83   : > { %932 = vsyncadd (%p1275_p7), %s271_s28, 4294966528  ;;  %s700_s7 = sshll.u32 %s261_s11, 4  ;;  %s289_s12 = scalar_lea.sflag [#allocation8], %s261_s11 }
  0x84   : > { %s1214_s10 = scalar_lea.vmem [#allocation6], %s700_s7  ;;  %s1216_s5 = scalar_lea.vmem [#allocation7], %s700_s7 }
  0x85   : > { %934 = dma.done.wait (%p1275_p7), %s289_s12, 256  }
  0x86   : > { %936 = vsyncadd (%p1275_p7), %s289_s12, 4294967040  ;;  %v368_v0 = vlaneseq  ;;  %v339_v2 = vld [vmem:[%s265_s18] sm:$0xff]  ;;  %v340_v3 = vld [vmem:[%s265_s18 + $0x8] sm:$0xff]  ;;  %vm404_vm1 = vcmask 1040384   ;;  %p335_p8 = scmp.lt.s32.totalorder %s1003_s19, 7 }
  0x87   : > { %v341_v4 = vld [vmem:[%s274_s9] sm:$0xff]  ;;  %v342_v5 = vld [vmem:[%s274_s9 + $0x8] sm:$0xff]  ;;  %v703_v7 = vld [vmem:[%s265_s18 + $0x10] sm:$0xff] }
  0x88   : > { %v1222_v1 = vshrl.u32 %v368_v0, 7  ;;  %v343_v6 = vsub.f32 %v339_v2, %v341_v4  ;;  %v704_v8 = vld [vmem:[%s265_s18 + $0x18] sm:$0xff]  ;;  %v344_v9 = vsub.f32 %v340_v3, %v342_v5  ;;  %v705_v10 = vld [vmem:[%s274_s9 + $0x10] sm:$0xff]  ;;  %s1281_s19 = smov (!%p335_p8, %s1003_s19), 7 }
  0x89   : > { %v706_v11 = vld [vmem:[%s274_s9 + $0x18] sm:$0xff]  ;;  %v437_v13 = vsub.f32 %v703_v7, %v705_v10  ;;  %s702_s15 = sshll.u32 %s1281_s19, 3 }
  0x8a   : > { %vm370_vm0 = vcmp.lt.s32.totalorder %v1222_v1, 7  ;;  %v345_v12 = vand.u32 2147483647, %v343_v6  ;;  %v438_v14 = vsub.f32 %v704_v8, %v706_v11  ;;  %v366_v15 = vrot.slane %v343_v6, 1 }
  0x8b   : > { %v346_v16 = vand.u32 2147483647, %v344_v9  ;;  %v396_v17 = vrot.slane %v344_v9, 7  ;;  %v367_v18 = vrot.slane %v344_v9, 1  ;;  %v439_v20 = vand.u32 2147483647, %v437_v13 }
  0x8c   : > { %v347_v19 = vmin.f32 %v345_v12, 1.0  ;;  %v440_v21 = vand.u32 2147483647, %v438_v14  ;;  %v460_v22 = vrot.slane %v437_v13, 1  ;;  %v461_v34 = vrot.slane %v438_v14, 1 }
  0x8d   : > { %v348_v23 = vmin.f32 %v346_v16, 1.0  ;;  %v398_v24 = vsub.f32 %v343_v6, %v396_v17  ;;  %v371_v25 = vsel %vm370_vm0, %v366_v15, %v367_v18  ;;  %v372_v26 = vsel %vm370_vm0, %v367_v18, %v366_v15  ;;  %v522_v17 = vld [vmem:[%s1214_s10 + $0x8] sm:$0xff]  ;;  %v523_v18 = vld [vmem:[%s1216_s5] sm:$0xff] }
  0x8e   : > { %v349_v27 = vmul.f32 0.5, %v347_v19  ;;  %v441_v28 = vmin.f32 %v439_v20, 1.0  ;;  %v442_v29 = vmin.f32 %v440_v21, 1.0  ;;  %v373_v30 = vsub.f32 %v371_v25, %v343_v6 }
  0x8f   : > { %v350_v31 = vmul.f32 0.5, %v348_v23  ;;  %v399_v32 = vand.u32 2147483647, %v398_v24  ;;  %v374_v33 = vsub.f32 %v372_v26, %v344_v9  ;;  %v462_v42 = vsel %vm370_vm0, %v460_v22, %v461_v34 }
  0x90   : > { %v351_v35 = vsub.f32 %v345_v12, %v349_v27  ;;  %v443_v36 = vmul.f32 0.5, %v441_v28  ;;  %v444_v37 = vmul.f32 0.5, %v442_v29  ;;  %v375_v38 = vand.u32 2147483647, %v373_v30  ;;  %v521_v12 = vld [vmem:[%s1214_s10] sm:$0xff]  ;;  %s338_s10 = scalar_lea.vmem %s1266_s4, %s702_s15 }
  0x91   : > { %v352_v39 = vsub.f32 %v346_v16, %v350_v31  ;;  %v400_v40 = vmin.f32 %v399_v32, 1.0  ;;  %v376_v41 = vand.u32 2147483647, %v374_v33  ;;  %v463_v50 = vsel %vm370_vm0, %v461_v34, %v460_v22 }
  0x92   : > { %v353_v43 = vmul.f32 %v351_v35, %v347_v19  ;;  %v445_v44 = vsub.f32 %v439_v20, %v443_v36  ;;  %v446_v45 = vsub.f32 %v440_v21, %v444_v37  ;;  %v377_v46 = vmin.f32 %v375_v38, 1.0  ;;  %v524_v19 = vld [vmem:[%s1216_s5 + $0x8] sm:$0xff] }
  0x93   : > { %v354_v47 = vmul.f32 %v352_v39, %v348_v23  ;;  %v401_v48 = vmul.f32 0.5, %v400_v40  ;;  %v378_v49 = vmin.f32 %v376_v41, 1.0  ;;  %v464_v54 = vsub.f32 %v462_v42, %v437_v13 }
  0x94   : > { %v447_v51 = vmul.f32 %v445_v44, %v441_v28  ;;  %v448_v52 = vmul.f32 %v446_v45, %v442_v29  ;;  %v379_v53 = vmul.f32 0.5, %v377_v46  ;;  %v465_v61 = vsub.f32 %v463_v50, %v438_v14 }
  0x95   : > { %v355_v55 = vadd.f32 %v354_v47, %v353_v43  ;;  %v417_v56 = vrot.slane %v354_v47, 7  ;;  %v402_v57 = vsub.f32 %v399_v32, %v401_v48  ;;  %v380_v58 = vmul.f32 0.5, %v378_v49 }
  0x96   : > { %v449_v59 = vadd.f32 %v448_v52, %v447_v51  ;;  %v381_v60 = vsub.f32 %v375_v38, %v379_v53  ;;  %v466_v62 = vand.u32 2147483647, %v464_v54  ;;  %v487_v3 = vrot.slane %v438_v14, 7 }
  0x97   : > { %356 = vadd.xlane.f32.xlu0 %v355_v55  ;;  %v419_v63 = vsel %vm404_vm1, %v417_v56, 0.0  ;;  %v403_v0 = vmul.f32 %v402_v57, %v400_v40  ;;  %v382_v2 = vsub.f32 %v376_v41, %v380_v58  ;;  %v467_v5 = vand.u32 2147483647, %v465_v61 }
  0x98   : > { %420 = vadd.xlane.f32.xlu1 %v419_v63  ;;  %v383_v4 = vmul.f32 %v381_v60, %v377_v46  ;;  %v468_v6 = vmin.f32 %v466_v62, 1.0  ;;  %v489_v9 = vsub.f32 %v437_v13, %v487_v3  ;;  %v525_v24 = vsub.f32 %v521_v12, %v523_v18 }
  0x99   : > { %v405_v7 = vsel %vm404_vm1, %v403_v0, 0.0  ;;  %v384_v8 = vmul.f32 %v382_v2, %v378_v49  ;;  %v469_v10 = vmin.f32 %v467_v5, 1.0  ;;  %v526_v25 = vsub.f32 %v522_v17, %v524_v19 }
  0x9a   : > { %v470_v11 = vmul.f32 0.5, %v468_v6  ;;  %v490_v16 = vand.u32 2147483647, %v489_v9  ;;  %v507_v28 = vrot.slane %v448_v52, 7  ;;  %v527_v30 = vmul.f32 %v525_v24, %v525_v24 }
  0x9b   : > { %450 = vadd.xlane.f32.xlu0 %v449_v59  ;;  %v385_v15 = vadd.f32 %v384_v8, %v383_v4  ;;  %v471_v14 = vmul.f32 0.5, %v469_v10  ;;  %v528_v31 = vmul.f32 %v526_v25, %v526_v25  ;;  %vm541_vm2 = vcmp.eq.s32.totalorder %v1222_v1, 2 }
  0x9c   : > { %406 = vadd.xlane.f32.xlu1 %v405_v7  ;;  %v472_v20 = vsub.f32 %v466_v62, %v470_v11  ;;  %v491_v21 = vmin.f32 %v490_v16, 1.0  ;;  %v509_v34 = vsel %vm404_vm1, %v507_v28, 0.0  ;;  %vm540_vm3 = vcmp.eq.s32.totalorder %v1222_v1, 1 }
  0x9d   : > { %v473_v22 = vsub.f32 %v467_v5, %v471_v14  ;;  %v529_v35 = vadd.f32 %v528_v31, %v527_v30  ;;  %vm539_vm4 = vcmp.eq.s32.totalorder %v1222_v1, 0 }
  0x9e   : > { %v474_v23 = vmul.f32 %v472_v20, %v468_v6  ;;  %v492_v26 = vmul.f32 0.5, %v491_v21 }
  0x9f   : > { %386 = vadd.xlane.f32.xlu0 %v385_v15  ;;  %v475_v13 = vmul.f32 %v473_v22, %v469_v10 }
  0xa0   : > { %v493_v27 = vsub.f32 %v490_v16, %v492_v26 }
  0xa1   : > { %v476_v29 = vadd.f32 %v475_v13, %v474_v23 }
  0xa2   : > { %v494_v32 = vmul.f32 %v493_v27, %v491_v21 }
  0xa3   : > { %477 = vadd.xlane.f32.xlu1 %v476_v29 }
  0xa4   : > { %v495_v33 = vsel %vm404_vm1, %v494_v32, 0.0 }
  0xa5   : > { %496 = vadd.xlane.f32.xlu0 %v495_v33 }
  0xa7   : > { %510 = vadd.xlane.f32.xlu1 %v509_v34 }
  0xa9   : > { %530 = vadd.xlane.f32.xlu0 %v529_v35 }
 0x124   : > { %v357_v36 = vpop.xlane.xlu0 %356 }
 0x125   : > { %v358_v37 = vrot.slane %v357_v36, 4  ;;  %v421_v38 = vpop.xlane.xlu1 %420 }
 0x126   : > { %v422_v39 = vrot.slane %v421_v38, 4 }
 0x127   : > { %v359_v40 = vadd.f32 %v358_v37, %v357_v36 }
 0x128   : > { %v451_v41 = vpop.xlane.xlu0 %450  ;;  %v423_v43 = vadd.f32 %v422_v39, %v421_v38 }
 0x129   : > { %v360_v42 = vrot.slane %v359_v40, 2  ;;  %v452_v44 = vrot.slane %v451_v41, 4  ;;  %v407_v45 = vpop.xlane.xlu1 %406 }
 0x12a   : > { %v408_v46 = vrot.slane %v407_v45, 4  ;;  %v424_v51 = vrot.slane %v423_v43, 2 }
 0x12b   : > { %v453_v47 = vadd.f32 %v452_v44, %v451_v41  ;;  %v361_v48 = vadd.f32 %v360_v42, %v359_v40 }
 0x12c   : > { %v409_v49 = vadd.f32 %v408_v46, %v407_v45  ;;  %v387_v50 = vpop.xlane.xlu0 %386  ;;  %v425_v61 = vadd.f32 %v424_v51, %v423_v43 }
 0x12d   : > { %v454_v52 = vrot.slane %v453_v47, 2  ;;  %v388_v53 = vrot.slane %v387_v50, 4  ;;  %v362_v54 = vrot.slane %v361_v48, 1 }
 0x12e   : > { %v410_v55 = vrot.slane %v409_v49, 2  ;;  %v426_v8 = vrot.slane %v425_v61, 1 }
 0x12f   : > { %v389_v56 = vadd.f32 %v388_v53, %v387_v50  ;;  %v363_v57 = vadd.f32 %v362_v54, %v361_v48  ;;  %v455_v62 = vadd.f32 %v454_v52, %v453_v47 }
 0x130   : > { %v411_v58 = vadd.f32 %v410_v55, %v409_v49  ;;  %v478_v60 = vpop.xlane.xlu1 %477  ;;  %v427_v21 = vadd.f32 %v426_v8, %v425_v61 }
 0x131   : > { %v390_v59 = vrot.slane %v389_v56, 2  ;;  %715 = vpush %v363_v57  ;;  %v479_v63 = vrot.slane %v478_v60, 4  ;;  %v456_v9 = vrot.slane %v455_v62, 1 }
 0x132   : > { %v497_v0 = vpop.xlane.xlu0 %496  ;;  %v412_v3 = vrot.slane %v411_v58, 1 }
 0x133   : > { %v391_v2 = vadd.f32 %v390_v59, %v389_v56  ;;  %v480_v4 = vadd.f32 %v479_v63, %v478_v60  ;;  %v498_v5 = vrot.slane %v497_v0, 4  ;;  %v457_v22 = vadd.f32 %v456_v9, %v455_v62 }
 0x134   : > { %v511_v6 = vpop.xlane.xlu1 %510  ;;  %v413_v17 = vadd.f32 %v412_v3, %v411_v58 }
 0x135   : > { %v392_v7 = vrot.slane %v391_v2, 1  ;;  %v481_v10 = vrot.slane %v480_v4, 2  ;;  %v499_v11 = vadd.f32 %v498_v5, %v497_v0  ;;  %v512_v12 = vrot.slane %v511_v6, 4 }
 0x136   : > { %v531_v15 = vpop.xlane.xlu0 %530 }
 0x137   : > { %v393_v16 = vadd.f32 %v392_v7, %v391_v2  ;;  %v500_v18 = vrot.slane %v499_v11, 2  ;;  %v513_v19 = vadd.f32 %v512_v12, %v511_v6  ;;  %v532_v14 = vrot.slane %v531_v15, 4 }
 0x138   : > { %v482_v20 = vadd.f32 %v481_v10, %v480_v4 }
 0x139   : > { %717 = vpush %v393_v16  ;;  %v514_v23 = vrot.slane %v513_v19, 2  ;;  %v533_v24 = vadd.f32 %v532_v14, %v531_v15  ;;  %v501_v26 = vadd.f32 %v500_v18, %v499_v11 }
 0x13a   : > { %719 = vpush %v413_v17  ;;  %v483_v25 = vrot.slane %v482_v20, 1 }
 0x13b   : > { %721 = vpush %v427_v21  ;;  %v515_v13 = vadd.f32 %v514_v23, %v513_v19  ;;  %v534_v27 = vrot.slane %v533_v24, 2  ;;  %v502_v29 = vrot.slane %v501_v26, 1 }
 0x13c   : > { %723 = vpush %v457_v22  ;;  %v484_v28 = vadd.f32 %v483_v25, %v482_v20 }
 0x13d   : > { %v535_v30 = vadd.f32 %v534_v27, %v533_v24  ;;  %v503_v31 = vadd.f32 %v502_v29, %v501_v26  ;;  %v516_v32 = vrot.slane %v515_v13, 1 }
 0x13e   : > { %725 = vpush %v484_v28 }
 0x13f   : > { %727 = vpush %v503_v31  ;;  %v517_v33 = vadd.f32 %v516_v32, %v515_v13  ;;  %v536_v34 = vrot.slane %v535_v30, 1 }
 0x141   : > { %729 = vpush %v517_v33  ;;  %v537_v35 = vadd.f32 %v536_v34, %v535_v30 }
 0x143   : > { %731 = vpush %v537_v35 }
 0x162   : > { %s716_s24 = spop %715 }
 0x16a   : > { %s718_s14 = spop %717 }
 0x16b   : > { %s720_s26 = spop %719 }
 0x16c   : > { %s722_s29 = spop %721  ;;  %s415_s21 = ssub.f32 %s718_s14, %s720_s26 }
 0x16d   : > { %s724_s13 = spop %723 }
 0x16e   : > { %s429_s8 = sadd.f32 %s722_s29, %s415_s21 }
 0x16f   : > { %s726_s6 = spop %725  ;;  %s459_s18 = sadd.f32 %s724_s13, %s716_s24 }
 0x170   : > { %s728_s22 = spop %727 }
 0x171   : > { %s505_s30 = ssub.f32 %s726_s6, %s728_s22  ;;  %v546_v39 = vstv %s459_s18 }
 0x172   : > { %s730_s11 = spop %729 }
 0x173   : > { %s519_s27 = sadd.f32 %s730_s11, %s505_s30 }
 0x174   : > { %s732_s25 = spop %731 }
 0x175   : > { %s520_s28 = sadd.f32 %s519_s27, %s429_s8  ;;  %v542_v36 = vstv %s732_s25 }
 0x176   : > { %v543_v37 = vsel %vm541_vm2, %v542_v36, 0.0 }
 0x177   : > { %v544_v38 = vstv %s520_s28 }
 0x178   : > { %v545_v40 = vsel %vm540_vm3, %v544_v38, %v543_v37 }
 0x179   : > { %v547_v41 = vsel %vm539_vm4, %v546_v39, %v545_v40 }
 0x17a   : > { %548 = vst [vmem:[%s338_s10] sm:$0xff] %v547_v41 }
 0x17b PF: > { %p20_p3 = scmp.ge.s32.totalorder %s1006_s20, 10   ;;  %s1276_s15 = smov %s943_s16 }
 0x17c   : > { %s1277_s16 = smov %s947_s17  ;;  %s1278_s17 = smov %s1016_s23 }
 0x17d   : > { %s1279_s18 = smov %s1006_s20  ;;  %22 = sbr.rel (!%p20_p3) target bundleno = 7 (0x7), region = 115 }
 0x184   :  { %568 = vsyncpa [#allocation3], 1 }
 0x185   :  { %570 = vsyncpa [#allocation3 + $0x1], 1 }
 0x186   :  { %571 = vsyncpa [#allocation5], 1 }
 0x187   :  { %573 = vsyncpa [#allocation5 + $0x1], 1 }
 0x188   :  { %574 = vsyncpa [#allocation8], 1 }
 0x189   :  { %576 = vsyncpa [#allocation8 + $0x1], 1 }

</bundles_post_ra>
